<compile_context>
chip_gen: v7x
topology: tpu7x:2x2x1
jax: 0.10.0
libtpu: 0.0.40
codegen_flags: <defaults>
</compile_context>

<pallas_src>
import functools

import jax
import jax.numpy as jnp
from jax.experimental import pallas as pl
from jax.experimental.pallas import tpu as pltpu


def _round_up(n, m):
    return (n + m - 1) // m * m


def _lookup_table_kernel(x_ref, wq_ref, bq_ref, kt_ref, v_ref, out_ref, *, w1):
    """Per batch-tile body: q = x@Wq'+bq'; attn = softmax(q @ kT); out = w1*x + attn@v'.

    Wq'/bq' carry the H**-0.5 attention scale; v' carries the w2 output weight;
    kT / v' are precomputed from the candidates at prepare_params() time.
    """
    x = x_ref[...]                                    # [TB, C] (f32 or bf16 stream)
    x_bf = x.astype(jnp.bfloat16)
    x_f32 = x.astype(jnp.float32)                     # epilogue in f32 (v5e VPU has no bf16)

    # q = x @ (scale * Wq) + scale * bq                              [TB, H] f32 acc
    q = jnp.dot(x_bf, wq_ref[...], preferred_element_type=jnp.float32) + bq_ref[...]

    # logits = q @ k.T  (kT precomputed -> plain dim-0 contraction)  [TB, N]
    logits = jnp.dot(q.astype(jnp.bfloat16), kt_ref[...],
                     preferred_element_type=jnp.float32)

    # Numerically stable softmax; denominator reciprocal on the EUP (free slot).
    m = jnp.max(logits, axis=-1, keepdims=True)
    e = jnp.exp(logits - m)
    denom = jnp.sum(e, axis=-1, keepdims=True)
    attn = e * pl.reciprocal(denom, approx=True)      # [TB, N]

    # attn @ (w2 * v)                                                [TB, C] f32 acc
    av = jnp.dot(attn.astype(jnp.bfloat16), v_ref[...],
                 preferred_element_type=jnp.float32)

    out_ref[...] = (w1 * x_f32 + av).astype(out_ref.dtype)


def prepare_params(params, *, w1=0.1, w2=0.9):
    """One-time parameter prep; everything grid-invariant is hoisted here.

      * k = cand @ Wk + bk and v = cand @ Wv + bv computed once in f32,
        k stored pre-transposed as kT [H, N] (bf16), v stored [N, C] (bf16)
        with the output weight w2 folded in,
      * attention scale H**-0.5 folded into Wq / bq,
      * matmul operands cast to bf16 (native MXU throughput, half the DMA),
      * biases reshaped to (1, D) VMEM tiles.
    """
    H = params["wq"].shape[1]
    scale = jnp.float32(H) ** -0.5
    k = params["cand"] @ params["wk"] + params["bk"]          # [N, H] f32
    v = params["cand"] @ params["wv"] + params["bv"]          # [N, C] f32
    return {
        "wq": (params["wq"] * scale).astype(jnp.bfloat16),               # [C, H]
        "bq": (params["bq"] * scale).astype(jnp.float32).reshape(1, H),  # [1, H]
        "kt": k.T.astype(jnp.bfloat16),                                  # [H, N]
        "v": (jnp.float32(w2) * v).astype(jnp.bfloat16),                 # [N, C]
        "w1": float(w1),
    }


def _vmem_limit_bytes(block_b, C, H, N, x_itemsize, out_itemsize):
    """Scoped-VMEM bound from the actual footprint (padded to (sublane,128) tiles),
    doubled for double-buffering, plus compiler-scratch headroom."""
    def tile_bytes(rows, cols, itemsize):
        sub = 8 * (4 // itemsize)                    # f32 -> 8 sublanes, bf16 -> 16
        return _round_up(rows, sub) * _round_up(cols, 128) * itemsize
    streamed = tile_bytes(block_b, C, x_itemsize) + tile_bytes(block_b, C, out_itemsize)
    resident = (tile_bytes(C, H, 2) + tile_bytes(1, H, 4)
                + tile_bytes(H, N, 2) + tile_bytes(N, C, 2))
    return min(2 * (streamed + resident) + (4 << 20), 64 << 20)


def lookup_table_forward(x, prepared, *, block_b=None, core_parallel=False, out_dtype=None):
    """x: [B, C]. prepared: output of prepare_params().

    1-D grid over the batch dim; Wq/bq/kT/v stay VMEM-resident via constant
    index_maps while x / out tiles are double-buffered behind compute. B is
    zero-padded to a multiple of block_b and the pad rows are sliced off
    (softmax rows are independent, so pad rows never affect real rows).
    """
    B, C = x.shape
    H = prepared["wq"].shape[1]
    N = prepared["kt"].shape[1]
    w1 = prepared["w1"]
    out_dtype = x.dtype if out_dtype is None else out_dtype

    # Batch tile: amortizes ~0.35 us per-grid-step overhead and fills the
    # 256-row MXU on v6e/v7x (128 rows already fill v5e); multiple of 8 sublanes.
    if block_b is None:
        block_b = min(_round_up(B, 8), 512)
    block_b = max(8, _round_up(block_b, 8))
    padded_b = _round_up(B, block_b)
    x_in = jnp.pad(x, ((0, padded_b - B), (0, 0))) if padded_b != B else x
    grid = (padded_b // block_b,)

    kernel = functools.partial(_lookup_table_kernel, w1=w1)

    def resident(shape):  # DMA'd once, stays VMEM-resident across the whole grid
        return pl.BlockSpec(shape, lambda i: (0, 0))

    x_spec = pl.BlockSpec((block_b, C), lambda i: (i, 0))
    # NOTE: out last dim is C=32 -> masked vst.msk stores; hidden under per-step
    # overhead at these sizes.
    # TODO(synk): if a bundle dump shows the store slot binding (v5e most likely),
    # zero-pad Wv/bv columns (and cand rows for N) to 128 at prep time and slice here.
    out_spec = pl.BlockSpec((block_b, C), lambda i: (i, 0))

    # "parallel" vs "arbitrary" barely changes codegen; CORE_PARALLEL shards the
    # batch axis explicitly over v7x's two TensorCores (use for large B on v7x).
    sem = (pltpu.CORE_PARALLEL,) if core_parallel else ("parallel",)

    out = pl.pallas_call(
        kernel,
        out_shape=jax.ShapeDtypeStruct((padded_b, C), out_dtype),
        grid_spec=pltpu.PrefetchScalarGridSpec(
            num_scalar_prefetch=0,
            grid=grid,
            in_specs=[
                x_spec,              # x   [B, C]   (tiled over batch)
                resident((C, H)),    # Wq  (scale folded, bf16)
                resident((1, H)),    # bq  (scale folded, f32)
                resident((H, N)),    # kT  (precomputed, bf16)
                resident((N, C)),    # v   (precomputed, w2 folded, bf16)
            ],
            out_specs=out_spec,
        ),
        compiler_params=pltpu.CompilerParams(
            dimension_semantics=sem,
            vmem_limit_bytes=_vmem_limit_bytes(
                block_b, C, H, N, x.dtype.itemsize, jnp.dtype(out_dtype).itemsize),
        ),
    )(x_in, prepared["wq"], prepared["bq"], prepared["kt"], prepared["v"])

    return out[:B] if padded_b != B else out


def init_params(key, channel, hidden_channel=128, num_candidate=32):
    """Deterministic synthetic init (torch-Linear-like scales), weights [in, out], f32."""
    ks = jax.random.split(key, 7)
    sq = 1.0 / (channel ** 0.5)
    sk = 1.0 / (hidden_channel ** 0.5)
    return {
        "wq": jax.random.uniform(ks[0], (channel, hidden_channel), jnp.float32, -sq, sq),
        "bq": jax.random.uniform(ks[1], (hidden_channel,), jnp.float32, -sq, sq),
        "wk": jax.random.uniform(ks[2], (hidden_channel, hidden_channel), jnp.float32, -sk, sk),
        "bk": jax.random.uniform(ks[3], (hidden_channel,), jnp.float32, -sk, sk),
        "wv": jax.random.uniform(ks[4], (hidden_channel, channel), jnp.float32, -sk, sk),
        "bv": jax.random.uniform(ks[5], (channel,), jnp.float32, -sk, sk),
        "cand": jax.random.normal(ks[6], (num_candidate, hidden_channel), jnp.float32),
    }


def _reference(x, params, w1=0.1, w2=0.9):
    """Pure-JAX f32 reference with the original (unfolded, unquantized) params."""
    q = x @ params["wq"] + params["bq"]
    k = params["cand"] @ params["wk"] + params["bk"]
    v = params["cand"] @ params["wv"] + params["bv"]
    attn = jax.nn.softmax((q @ k.T) * (q.shape[1] ** -0.5), axis=-1)
    return w1 * x + w2 * (attn @ v)


if __name__ == "__main__":
    B, C, H, N = 20, 32, 128, 32        # B=20 exercises the pad-to-block-multiple path
    key = jax.random.PRNGKey(0)
    kx, kp = jax.random.split(key)
    x = jax.random.normal(kx, (B, C), jnp.float32)

    raw_params = init_params(kp, C, hidden_channel=H, num_candidate=N)
    prepared = prepare_params(raw_params, w1=0.1, w2=0.9)
    ref = _reference(x, raw_params, w1=0.1, w2=0.9)

    # Default path: one padded batch tile (block_b=24), grid=(1,).
    out = jax.block_until_ready(lookup_table_forward(x, prepared))
    assert out.shape == (B, C)
    # Tolerance accounts for bf16 matmul operands (f32 accumulation) + approx reciprocal.
    assert jnp.allclose(out, ref, atol=3e-2, rtol=3e-2), "mismatch vs reference (default tile)"

    # Multi-step path: block_b=8 -> grid=(3,) so the batch pipeline is exercised too.
    out2 = jax.block_until_ready(lookup_table_forward(x, prepared, block_b=8))
    assert jnp.allclose(out2, ref, atol=3e-2, rtol=3e-2), "mismatch vs reference (block_b=8)"

    print("KERNEL_OK")
</pallas_src>

<mosaic_0001>
module attributes {stable_mosaic.version = 11 : i64} {
  func.func @_lookup_table_kernel(%arg0: i32, %arg1: memref<24x32xf32, #tpu.memory_space<vmem>>, %arg2: memref<32x128xbf16, #tpu.memory_space<vmem>>, %arg3: memref<1x128xf32, #tpu.memory_space<vmem>>, %arg4: memref<128x32xbf16, #tpu.memory_space<vmem>>, %arg5: memref<32x32xbf16, #tpu.memory_space<vmem>>, %arg6: memref<24x32xf32, #tpu.memory_space<vmem>>) attributes {dimension_semantics = [#tpu.dimension_semantics<parallel>], iteration_bounds = array<i64: 1>, scalar_prefetch = 0 : i64, scratch_operands = 0 : i64, tpu.core_type = #tpu.core_type<tc>, window_params = [{transform_indices = @transform_0, window_bounds = array<i64: 24, 32>}, {pipeline_mode = #tpu.pipeline_mode<synchronous>, transform_indices = @transform_1, window_bounds = array<i64: 32, 128>}, {pipeline_mode = #tpu.pipeline_mode<synchronous>, transform_indices = @transform_2, window_bounds = array<i64: 1, 128>}, {pipeline_mode = #tpu.pipeline_mode<synchronous>, transform_indices = @transform_3, window_bounds = array<i64: 128, 32>}, {pipeline_mode = #tpu.pipeline_mode<synchronous>, transform_indices = @transform_4, window_bounds = array<i64: 32, 32>}, {transform_indices = @transform_5, window_bounds = array<i64: 24, 32>}]} {
    %c0 = arith.constant 0 : index
    %c0_0 = arith.constant 0 : index
    %0 = vector.load %arg1[%c0, %c0_0] : memref<24x32xf32, #tpu.memory_space<vmem>>, vector<24x32xf32>
    %1 = arith.truncf %0 : vector<24x32xf32> to vector<24x32xbf16>
    %c0_1 = arith.constant 0 : index
    %c0_2 = arith.constant 0 : index
    %2 = vector.load %arg2[%c0_1, %c0_2] : memref<32x128xbf16, #tpu.memory_space<vmem>>, vector<32x128xbf16>
    %cst = arith.constant dense<0.000000e+00> : vector<24x128xf32>
    %3 = tpu.matmul %1, %2, %cst {dimension_numbers = #tpu.dot_dimension_numbers<[1], [0], [0], [1], [0, 0, 1, 1], [], []>} : vector<24x32xbf16>, vector<32x128xbf16>, vector<24x128xf32> -> vector<24x128xf32>
    %c0_3 = arith.constant 0 : index
    %c0_4 = arith.constant 0 : index
    %4 = vector.load %arg3[%c0_3, %c0_4] : memref<1x128xf32, #tpu.memory_space<vmem>>, vector<1x128xf32>
    %5 = vector.broadcast %4 : vector<1x128xf32> to vector<24x128xf32>
    %6 = arith.addf %3, %5 : vector<24x128xf32>
    %7 = arith.truncf %6 : vector<24x128xf32> to vector<24x128xbf16>
    %c0_5 = arith.constant 0 : index
    %c0_6 = arith.constant 0 : index
    %8 = vector.load %arg4[%c0_5, %c0_6] : memref<128x32xbf16, #tpu.memory_space<vmem>>, vector<128x32xbf16>
    %cst_7 = arith.constant dense<0.000000e+00> : vector<24x32xf32>
    %9 = tpu.matmul %7, %8, %cst_7 {dimension_numbers = #tpu.dot_dimension_numbers<[1], [0], [0], [1], [0, 0, 1, 1], [], []>} : vector<24x128xbf16>, vector<128x32xbf16>, vector<24x32xf32> -> vector<24x32xf32>
    %cst_8 = arith.constant dense<0xFF800000> : vector<24xf32>
    %10 = vector.multi_reduction <maximumf>, %9, %cst_8 [1] : vector<24x32xf32> to vector<24xf32>
    %11 = vector.shape_cast %10 : vector<24xf32> to vector<24x1xf32>
    %12 = vector.broadcast %11 : vector<24x1xf32> to vector<24x32xf32>
    %13 = arith.subf %9, %12 : vector<24x32xf32>
    %14 = math.exp %13 : vector<24x32xf32>
    %cst_9 = arith.constant dense<0.000000e+00> : vector<24xf32>
    %15 = vector.multi_reduction <add>, %14, %cst_9 [1] : vector<24x32xf32> to vector<24xf32>
    %16 = vector.shape_cast %15 : vector<24xf32> to vector<24x1xf32>
    %17 = tpu.reciprocal %16 {approx = true} : vector<24x1xf32> -> vector<24x1xf32>
    %18 = vector.broadcast %17 : vector<24x1xf32> to vector<24x32xf32>
    %19 = arith.mulf %14, %18 : vector<24x32xf32>
    %20 = arith.truncf %19 : vector<24x32xf32> to vector<24x32xbf16>
    %c0_10 = arith.constant 0 : index
    %c0_11 = arith.constant 0 : index
    %21 = vector.load %arg5[%c0_10, %c0_11] : memref<32x32xbf16, #tpu.memory_space<vmem>>, vector<32x32xbf16>
    %cst_12 = arith.constant dense<0.000000e+00> : vector<24x32xf32>
    %22 = tpu.matmul %20, %21, %cst_12 {dimension_numbers = #tpu.dot_dimension_numbers<[1], [0], [0], [1], [0, 0, 1, 1], [], []>} : vector<24x32xbf16>, vector<32x32xbf16>, vector<24x32xf32> -> vector<24x32xf32>
    %cst_13 = arith.constant 1.000000e-01 : f32
    %23 = vector.broadcast %cst_13 : f32 to vector<24x32xf32>
    %24 = arith.mulf %23, %0 : vector<24x32xf32>
    %25 = arith.addf %24, %22 : vector<24x32xf32>
    %c0_14 = arith.constant 0 : index
    %c0_15 = arith.constant 0 : index
    %26 = vector.load %arg6[%c0_14, %c0_15] : memref<24x32xf32, #tpu.memory_space<vmem>>, vector<24x32xf32>
    tpu.vector_store %arg6[%c0_14, %c0_15], %25 {strides = array<i32>} : memref<24x32xf32, #tpu.memory_space<vmem>>, vector<24x32xf32>,
    return
  }
  func.func @transform_0(%arg0: i32) -> (i32, i32) {
    %c0_i32 = arith.constant 0 : i32
    %c0_i32_0 = arith.constant 0 : i32
    return %arg0, %c0_i32 : i32, i32
  }
  func.func @transform_1(%arg0: i32) -> (i32, i32) {
    %c0_i32 = arith.constant 0 : i32
    %c0_i32_0 = arith.constant 0 : i32
    %c0_i32_1 = arith.constant 0 : i32
    return %c0_i32, %c0_i32_0 : i32, i32
  }
  func.func @transform_2(%arg0: i32) -> (i32, i32) {
    %c0_i32 = arith.constant 0 : i32
    %c0_i32_0 = arith.constant 0 : i32
    %c0_i32_1 = arith.constant 0 : i32
    return %c0_i32, %c0_i32_0 : i32, i32
  }
  func.func @transform_3(%arg0: i32) -> (i32, i32) {
    %c0_i32 = arith.constant 0 : i32
    %c0_i32_0 = arith.constant 0 : i32
    %c0_i32_1 = arith.constant 0 : i32
    return %c0_i32, %c0_i32_0 : i32, i32
  }
  func.func @transform_4(%arg0: i32) -> (i32, i32) {
    %c0_i32 = arith.constant 0 : i32
    %c0_i32_0 = arith.constant 0 : i32
    %c0_i32_1 = arith.constant 0 : i32
    return %c0_i32, %c0_i32_0 : i32, i32
  }
  func.func @transform_5(%arg0: i32) -> (i32, i32) {
    %c0_i32 = arith.constant 0 : i32
    %c0_i32_0 = arith.constant 0 : i32
    return %arg0, %c0_i32 : i32, i32
  }
}

</mosaic_0001>

<bundles_post_ra>
// kernel: tpu_custom_call.1
= control target key start
LH: loop header
LB: loop body
LE: loop exit
PB: predicated region body
PF: predicated region fallthrough
CT: control target
= control target key end

     0   :  { %vm50_vm0 = vcmask 261120   ;;  %s590_s0 = inlined_call_operand.vmem [shape: f32[24,32], index: 0, kind: input, shape index: {}]   ;;  %s591_s1 = inlined_call_operand.vmem [shape: bf16[32,128], index: 1, kind: input, shape index: {}]   ;;  %s592_s2 = inlined_call_operand.vmem [shape: f32[1,128], index: 2, kind: input, shape index: {}]   ;;  %s593_s3 = inlined_call_operand.vmem [shape: bf16[128,32], index: 3, kind: input, shape index: {}]   ;;  %s594_s4 = inlined_call_operand.vmem [shape: bf16[32,32], index: 4, kind: input, shape index: {}]   ;;  %s595_s5 = inlined_call_operand.hbm [shape: f32[24,32], index: 5, kind: output, shape index: {}]  }
   0x1   :  { %v423_v0 = vld [vmem:[%s591_s1] sm:$0xff]   ;;  %v424_v1 = vld [vmem:[%s591_s1 + $0x8] sm:$0xff]   ;;  %v523_v4 = vld [vmem:[%s590_s0 + $0x10] sm:$0xff] }
   0x2   :  { %384 = vmatprep.subr.bf16.mxu0 %v423_v0  ;;  %v513_v2 = vld [vmem:[%s590_s0] sm:$0xff]  ;;  %v518_v3 = vld [vmem:[%s590_s0 + $0x8] sm:$0xff]  ;;  %v26_v8 = vpack.c.bf16 %v523_v4, %v523_v4  ;;  %v427_v9 = vld [vmem:[%s593_s3 + $0x10] sm:$0xff]  }
   0x3   :  { %385 = vmatpush3.bf16.msra.mxu0 %v423_v0  ;;  %v25_v5 = vpack.c.bf16 %v518_v3, %v513_v2  ;;  %v425_v6 = vld [vmem:[%s593_s3] sm:$0xff]   ;;  %v426_v7 = vld [vmem:[%s593_s3 + $0x8] sm:$0xff]   ;;  %v428_v10 = vld [vmem:[%s593_s3 + $0x18] sm:$0xff]  }
   0x4   :  { %386 = vmatprep.subr.bf16.mxu0 %v424_v1  ;;  %392 = vmatprep.subr.bf16.mxu1 %v425_v6 }
   0x5   :  { %388 = vmatprep.mubr.msk.bf16.mxu0 %vm50_vm0, %v25_v5  ;;  %393 = vmatpush3.bf16.msra.mxu1 %v425_v6 }
   0x6   :  { %394 = vmatprep.subr.bf16.mxu1 %v426_v7 }
   0x7   :  { %387 = vmatpush3.bf16.msra.mxu0 %v424_v1 }
   0x9   :  { %395 = vmatpush3.bf16.msra.mxu1 %v426_v7 }
   0xa   :  { %389 = vmatmul.mubr.msk.bf16.vlgmr.msra.gmra.mrb[0].mxu0 %vm50_vm0, %v26_v8  ;;  %396 = vmatprep.subr.bf16.mxu1 %v427_v9 }
   0xb   :  { %10 = vsyncpa [#allocation3], 0  ;;  %v429_v11 = vld [vmem:[%s593_s3 + $0x20] sm:$0xff]   ;;  %v430_v12 = vld [vmem:[%s593_s3 + $0x28] sm:$0xff]   ;;  %v326_v60 = vmul.f32 0.1, %v523_v4 }
   0xc   :  { %v431_v13 = vld [vmem:[%s593_s3 + $0x30] sm:$0xff]   ;;  %v432_v14 = vld [vmem:[%s593_s3 + $0x38] sm:$0xff]   ;;  %v349_v16 = vld [vmem:[%s592_s2] ss:$0 sm:$0xff]  ;;  %v324_v61 = vmul.f32 0.1, %v513_v2 }
   0xd   :  { %397 = vmatpush3.bf16.msra.mxu1 %v427_v9  ;;  %v433_v47 = vld [vmem:[%s594_s4] sm:$0xff]   ;;  %v434_v48 = vld [vmem:[%s594_s4 + $0x8] sm:$0xff]   ;;  %v325_v63 = vmul.f32 0.1, %v518_v3  ;;  %s471_s4 = smov [#allocation2]  }
   0xe   :  { %398 = vmatprep.subr.bf16.mxu1 %v428_v10  ;;  %412 = vmatprep.subr.bf16.mxu0 %v433_v47  ;;  %s338_s21 = sshll.u32 %s471_s4, 4  ;;  %s339_s21 = int_to_ptr.vmem [resolvable:$true] %s338_s21 }
   0xf   :  { %413 = vmatpush3.bf16.msra.mxu0 %v433_v47  ;;  %s447_s22 = scalar_lea.vmem %s339_s21, 384  ;;  %p452_p1 = scmp.lt.s32.totalorder %s339_s21, %s339_s21 }
  0x10   :  { %414 = vmatprep.subr.bf16.mxu0 %v434_v48  ;;  %p448_p0 = scmp.ne.s32.totalorder %s339_s21, %s447_s22  ;;  %p453_p2 = scmp.lt.s32.totalorder %s447_s22, %s447_s22 }
  0x11   :  { %399 = vmatpush3.bf16.msra.mxu1 %v428_v10 }
  0x12   :  { %400 = vmatprep.subr.bf16.mxu1 %v429_v11  ;;  %p454_p3 = por %p453_p2, %p452_p1 }
  0x13   :  { %415 = vmatpush3.bf16.msra.mxu0 %v434_v48 }
  0x14   :  { %p455_p4 = pnand %p454_p3, %p448_p0 }
  0x15   :  { %401 = vmatpush3.bf16.msra.mxu1 %v429_v11 }
  0x16   :  { %402 = vmatprep.subr.bf16.mxu1 %v430_v12 }
  0x19   :  { %403 = vmatpush3.bf16.msra.mxu1 %v430_v12 }
  0x1a   :  { %404 = vmatprep.subr.bf16.mxu1 %v431_v13 }
  0x1d   :  { %405 = vmatpush3.bf16.msra.mxu1 %v431_v13 }
  0x1e   :  { %406 = vmatprep.subr.bf16.mxu1 %v432_v14 }
  0x21   :  { %407 = vmatpush3.bf16.msra.mxu1 %v432_v14 }
  0xdd   :  { %v390_v15 = vpop.f32.mrb[0].mxu0 }
  0xde   :  { %v91_v17 = vpop.f32.mrb[1].mxu0  ;;  %v100_v19 = vadd.f32 %v390_v15, %v349_v16 }
  0xdf   :  { %v391_v18 = vpop.f32.mrb[2].mxu0  ;;  %v92_v21 = vadd.f32 %v349_v16, %v91_v17 }
  0xe0   :  { %v94_v20 = vpop.f32.mrb[3].mxu0  ;;  %v106_v24 = vpack.c.bf16 %v100_v19, %v100_v19 }
  0xe1   :  { %v95_v22 = vadd.f32 %v349_v16, %v94_v20 }
  0xe3   :  { %v105_v23 = vpack.c.bf16 %v95_v22, %v92_v21 }
  0xe5   :  { %408 = vmatprep.mubr.bf16.mxu1 %v105_v23 }
  0xe6   :  { %409 = vmatmul.mubr.bf16.vlgmr.msra.gmra.mrb[0].mxu1 %v106_v24 }
 0x1b9   :  { %v410_v25 = vpop.f32.mrb[0].mxu1 }
 0x1ba   :  { %v205_v26 = vpop.f32.mrb[1].mxu1  ;;  %v225_v27 = vsel %vm50_vm0, %v410_v25, -inf }
 0x1bb   :  { %226 = vmax.xlane.f32.xlu1 %v225_v27  ;;  %v411_v28 = vpop.f32.mrb[2].mxu1  ;;  %v219_v29 = vsel %vm50_vm0, %v205_v26, -inf }
 0x1bc   :  { %220 = vmax.xlane.f32.xlu0 %v219_v29  ;;  %v208_v30 = vpop.f32.mrb[3].mxu1 }
 0x1bd   :  { %v222_v31 = vsel %vm50_vm0, %v208_v30, -inf }
 0x1c0   :  { %223 = vmax.xlane.f32.xlu0 %v222_v31 }
 0x248   :  { %v227_v32 = vpop.xlane.xlu1 %226 }
 0x249   :  { %v230_v33 = vsub.f32 %v410_v25, %v227_v32  ;;  %v221_v34 = vpop.xlane.xlu0 %220 }
 0x24a   :  { %v228_v35 = vsub.f32 %v205_v26, %v221_v34 }
 0x24b   :  { %v235_v36 = vmul.f32 1.442695, %v230_v33 }
 0x24c   :  { %v231_v37 = vmul.f32 1.442695, %v228_v35 }
 0x24d   :  { %v224_v38 = vpop.xlane.xlu0 %223 }
 0x24e   :  { %435 = vpow2.f32 %v231_v37  ;;  %v229_v39 = vsub.f32 %v208_v30, %v224_v38 }
 0x24f   :  { %437 = vpow2.f32 %v235_v36 }
 0x250   :  { %v233_v40 = vmul.f32 1.442695, %v229_v39 }
 0x252   :  { %439 = vpow2.f32 %v233_v40 }
 0x258   :  { %v436_v41 = vpop.eup %435 }
 0x259   :  { %v237_v42 = vsel %vm50_vm0, %v436_v41, 0.0  ;;  %v438_v43 = vpop.eup %437 }
 0x25a   :  { %238 = vadd.xlane.f32.xlu1 %v237_v42  ;;  %v243_v45 = vsel %vm50_vm0, %v438_v43, 0.0 }
 0x25c   :  { %v440_v44 = vpop.eup %439 }
 0x25d   :  { %v240_v46 = vsel %vm50_vm0, %v440_v44, 0.0 }
 0x25e   :  { %244 = vadd.xlane.f32.xlu1 %v243_v45  ;;  %241 = vadd.xlane.f32.xlu0 %v240_v46 }
 0x2e7   :  { %v239_v49 = vpop.xlane.xlu1 %238 }
 0x2e8   :  { %441 = vrcp.f32 %v239_v49 }
 0x2eb   :  { %v245_v50 = vpop.xlane.xlu1 %244  ;;  %v242_v51 = vpop.xlane.xlu0 %241 }
 0x2ec   :  { %443 = vrcp.f32 %v245_v50 }
 0x2ed   :  { %445 = vrcp.f32 %v242_v51 }
 0x2f2   :  { %v442_v52 = vpop.eup %441 }
 0x2f3   :  { %v249_v56 = vmul.f32 %v442_v52, %v436_v41 }
 0x2f6   :  { %v444_v53 = vpop.eup %443 }
 0x2f7   :  { %v446_v54 = vpop.eup %445  ;;  %v251_v55 = vmul.f32 %v444_v53, %v438_v43 }
 0x2f8   :  { %v250_v57 = vmul.f32 %v446_v54, %v440_v44 }
 0x2f9   :  { %v253_v58 = vpack.c.bf16 %v251_v55, %v251_v55 }
 0x2fa   :  { %v252_v59 = vpack.c.bf16 %v250_v57, %v249_v56 }
 0x2fc   :  { %416 = vmatprep.mubr.msk.bf16.mxu0 %vm50_vm0, %v252_v59 }
 0x2fd   :  { %417 = vmatmul.mubr.msk.bf16.vlgmr.msra.gmra.mrb[4].mxu0 %vm50_vm0, %v253_v58 }
 0x3d0   :  { %v418_v62 = vpop.f32.mrb[4].mxu0 }
 0x3d1   :  { %v329_v0 = vadd.f32 %v418_v62, %v326_v60  ;;  %v310_v1 = vpop.f32.mrb[5].mxu0 }
 0x3d2   :  { %v327_v5 = vadd.f32 %v324_v61, %v310_v1  ;;  %v419_v6 = vpop.f32.mrb[6].mxu0 }
 0x3d3   :  { %332 = vst.msk [vmem:[#allocation2 + $0x10] sm:$0xff] %vm50_vm0, %v329_v0  ;;  %v313_v7 = vpop.f32.mrb[7].mxu0 }
 0x3d4   :  { %330 = vst.msk [vmem:[#allocation2] sm:$0xff] %vm50_vm0, %v327_v5  ;;  %v328_v8 = vadd.f32 %v325_v63, %v313_v7 }
 0x3d6   :  { %331 = vst.msk [vmem:[#allocation2 + $0x8] sm:$0xff] %vm50_vm0, %v328_v8 }
 0x3d7   :  { %458 = shalt.err (!%p455_p4)
}
 0x3d8   :  { %s459_s25 = scalar_lea.hbm %s595_s5, 384 }
 0x3d9   :  { %p460_p5 = scmp.ne.s32.totalorder %s595_s5, %s459_s25  ;;  %p463_p6 = scmp.lt.u32.totalorder %s459_s25, %s595_s5 }
 0x3db   :  { %p465_p7 = pnand %p463_p6, %p460_p5 }
 0x3dd   :  { %468 = shalt.err (!%p465_p7)
}
 0x3de   :  { %s472_s29 = smov 128   ;;  %s473_s30 = smov 8  }
 0x3df   :  { %344 = dma.vmem_to_hbm [thread:$0]  %s339_s21, 384, %s595_s5, [#allocation3], %s472_s29, %s472_s29, %s473_s30  }
 0x3e0   :  { %469 = dma.done.wait [#allocation3], 384  }
 0x3e1   :  { %470 = vsyncadd [#allocation3], 4294966912 }
 0x3e2   :  { %348 = vsyncpa [#allocation3], 1 }

</bundles_post_ra>
